<compile_context>
chip_gen: v6e
topology: v6e:2x2x1
jax: 0.10.0
libtpu: 0.0.40
codegen_flags: <defaults>
</compile_context>

<pallas_src>
import jax
import jax.numpy as jnp
from jax import lax
from jax.experimental import pallas as pl

NEG_INF = -1e30
LEAKY_SLOPE = 0.2
BN_EPS = 1e-5


def _bf16_softmax_ok():
    """bf16 softmax only where EUP/VPU are bf16-native (v6e / v7x)."""
    try:
        kind = jax.devices()[0].device_kind.lower()
    except Exception:
        return False
    return not any(t in kind for t in ("v2", "v3", "v4", "v5"))


# --------------------------------------------------------------------------
# Fused forward kernel: num_layers x (GAT conv -> [BN -> ReLU]) in one call.
#   x_ref     (N, C)      bf16   node features (pre-cast in wrapper)
#   bias_ref  (N, N)      f32    additive mask bias: 0 where edge j->i, -1e30 else
#   wcat_ref  (L, C, H+1) bf16   per layer [W | W@a_dst]
#   wasrc_ref (L, 1, C)   bf16   per layer (W@a_src)^T
#   ss_ref    (L, 2, H)   f32    per layer [BN scale ; conv-bias+BN shift]
# --------------------------------------------------------------------------
def make_gat_fused_kernel(num_layers, hidden, softmax_bf16):
    def kernel(x_ref, bias_ref, wcat_ref, wasrc_ref, ss_ref, out_ref):
        bias = bias_ref[...]                                    # (N, N) f32
        x = x_ref[...]                                          # (N, C) bf16

        for i in range(num_layers):
            wcat = wcat_ref[i]                                  # (C, H+1) bf16
            wasrc = wasrc_ref[i]                                # (1, C)   bf16
            ss = ss_ref[i]                                      # (2, H)   f32
            scale = ss[0:1, :]                                  # (1, H)
            shift = ss[1:2, :]                                  # (1, H)

            # One MXU pass produces both h and e_dst (a_dst folded into W).
            hb = jnp.dot(x, wcat, preferred_element_type=jnp.float32)   # (N, H+1)
            h = hb[:, :hidden]                                           # (N, H)
            e_dst = hb[:, hidden:hidden + 1]                             # (N, 1)

            # e_src as a row (1, N): contract the feature axis directly so no
            # column->row transpose is needed.
            e_src_row = lax.dot_general(
                wasrc, x,
                dimension_numbers=(((1,), (1,)), ((), ())),
                preferred_element_type=jnp.float32,
            )                                                            # (1, N)

            # leaky-ReLU via max (no compare/select); mask via additive bias.
            logits = e_dst + e_src_row                                   # (N, N)
            logits = jnp.maximum(logits, LEAKY_SLOPE * logits)
            masked = logits + bias

            # Masked softmax over incoming edges. Self-loops guarantee >=1
            # valid entry per row; denom clamped anyway so isolated rows
            # cannot produce NaN (they degrade to uniform attention).
            m = jnp.max(masked, axis=1, keepdims=True)
            z = masked - m
            if softmax_bf16:
                p = jnp.exp(z.astype(jnp.bfloat16))                      # bf16 EUP
                denom = jnp.maximum(
                    jnp.sum(p.astype(jnp.float32), axis=1, keepdims=True), 1e-20)
                inv = pl.reciprocal(denom, approx=True)                  # EUP slot
                alpha = p * inv.astype(jnp.bfloat16)                     # (N,N) bf16
            else:
                p = jnp.exp(z)
                denom = jnp.maximum(jnp.sum(p, axis=1, keepdims=True), 1e-20)
                inv = pl.reciprocal(denom, approx=True)
                alpha = (p * inv).astype(jnp.bfloat16)

            out = jnp.dot(alpha, h.astype(jnp.bfloat16),
                          preferred_element_type=jnp.float32)            # (N, H)
            out = out * scale + shift                                    # bias + BN
            if i < num_layers - 1:
                out = jnp.maximum(out, 0.0)                              # ReLU
                x = out.astype(jnp.bfloat16)
            else:
                out_ref[...] = out

    return kernel


def _prepare_packed_params(conv_params, norm_params, num_layers):
    """Fold a_dst into W, fold conv bias + eval-BN, stack per-layer params."""
    wcats, wasrcs, sss = [], [], []
    for i in range(num_layers):
        w, a_src, a_dst, b = conv_params[i]
        wcats.append(jnp.concatenate([w, w @ a_dst], axis=1))            # (C, H+1)
        wasrcs.append((w @ a_src).T)                                     # (1, C)
        if i < num_layers - 1:
            gamma, beta, mean, var = norm_params[i]
            s = gamma * lax.rsqrt(var + BN_EPS)                          # (1, H)
            scale = s
            shift = b * s + beta - mean * s
        else:
            scale = jnp.ones_like(b)
            shift = b
        sss.append(jnp.stack([scale[0], shift[0]], axis=0))              # (2, H)
    wcat_all = jnp.stack(wcats).astype(jnp.bfloat16)                     # (L, C, H+1)
    wasrc_all = jnp.stack(wasrcs).astype(jnp.bfloat16)                   # (L, 1, C)
    ss_all = jnp.stack(sss).astype(jnp.float32)                          # (L, 2, H)
    return wcat_all, wasrc_all, ss_all


def gat_forward(x, adj_i8, conv_params, norm_params, num_layers):
    n = x.shape[0]
    hidden = conv_params[0][0].shape[1]
    wcat_all, wasrc_all, ss_all = _prepare_packed_params(
        conv_params, norm_params, num_layers)

    x_bf16 = x.astype(jnp.bfloat16)
    # Additive mask bias: 0 where edge src->dst exists, -1e30 otherwise.
    bias = jnp.where(adj_i8 > 0, 0.0, NEG_INF).astype(jnp.float32)

    softmax_bf16 = _bf16_softmax_ok()
    full = lambda arr: pl.BlockSpec(arr.shape, lambda: (0,) * arr.ndim)

    return pl.pallas_call(
        make_gat_fused_kernel(num_layers, hidden, softmax_bf16),
        out_shape=jax.ShapeDtypeStruct((n, hidden), jnp.float32),
        in_specs=[full(x_bf16), full(bias), full(wcat_all),
                  full(wasrc_all), full(ss_all)],
        out_specs=pl.BlockSpec((n, hidden), lambda: (0, 0)),
    )(x_bf16, bias, wcat_all, wasrc_all, ss_all)


# --------------------------------------------------------------------------
# Pure-JAX reference with identical folded/packed params & dtypes (exact
# division instead of approx reciprocal) for a sanity check.
# --------------------------------------------------------------------------
def gat_reference(x, adj_i8, conv_params, norm_params, num_layers, softmax_bf16):
    hidden = conv_params[0][0].shape[1]
    wcat_all, wasrc_all, ss_all = _prepare_packed_params(
        conv_params, norm_params, num_layers)
    bias = jnp.where(adj_i8 > 0, 0.0, NEG_INF).astype(jnp.float32)
    xb = x.astype(jnp.bfloat16)
    for i in range(num_layers):
        wcat, wasrc = wcat_all[i], wasrc_all[i]
        scale, shift = ss_all[i, 0:1, :], ss_all[i, 1:2, :]
        hb = jnp.dot(xb, wcat, preferred_element_type=jnp.float32)
        h, e_dst = hb[:, :hidden], hb[:, hidden:hidden + 1]
        e_src_row = lax.dot_general(
            wasrc, xb, dimension_numbers=(((1,), (1,)), ((), ())),
            preferred_element_type=jnp.float32)
        logits = e_dst + e_src_row
        logits = jnp.maximum(logits, LEAKY_SLOPE * logits)
        masked = logits + bias
        z = masked - jnp.max(masked, axis=1, keepdims=True)
        if softmax_bf16:
            p = jnp.exp(z.astype(jnp.bfloat16))
            denom = jnp.maximum(
                jnp.sum(p.astype(jnp.float32), axis=1, keepdims=True), 1e-20)
            alpha = (p.astype(jnp.float32) / denom).astype(jnp.bfloat16)
        else:
            p = jnp.exp(z)
            denom = jnp.maximum(jnp.sum(p, axis=1, keepdims=True), 1e-20)
            alpha = (p / denom).astype(jnp.bfloat16)
        out = jnp.dot(alpha, h.astype(jnp.bfloat16),
                      preferred_element_type=jnp.float32)
        out = out * scale + shift
        if i < num_layers - 1:
            xb = jnp.maximum(out, 0.0).astype(jnp.bfloat16)
        else:
            return out


def init_params(key, in_channels, hidden_channels, num_layers):
    conv_params, norm_params = [], []
    for i in range(num_layers):
        key, k1, k2, k3 = jax.random.split(key, 4)
        # NOTE: reference builds every layer as MyGATConv(in_channels, hidden).
        w = jax.random.normal(k1, (in_channels, hidden_channels), jnp.float32) * 0.1
        a_src = jax.random.normal(k2, (hidden_channels, 1), jnp.float32) * 0.1
        a_dst = jax.random.normal(k3, (hidden_channels, 1), jnp.float32) * 0.1
        b = jnp.zeros((1, hidden_channels), jnp.float32)
        conv_params.append((w, a_src, a_dst, b))
        if i < num_layers - 1:
            gamma = jnp.ones((1, hidden_channels), jnp.float32)
            beta = jnp.zeros((1, hidden_channels), jnp.float32)
            mean = jnp.zeros((1, hidden_channels), jnp.float32)
            var = jnp.ones((1, hidden_channels), jnp.float32)
            norm_params.append((gamma, beta, mean, var))
    return conv_params, norm_params


if __name__ == "__main__":
    key = jax.random.PRNGKey(0)

    N = 16                # number of graph nodes
    IN_CH = 32            # in_channels == hidden_channels (required by reference)
    HID = 32
    NUM_LAYERS = 2
    E = 48                # number of directed edges

    key, kx, ke, kp = jax.random.split(key, 4)
    x = jax.random.normal(kx, (N, IN_CH), jnp.float32)

    # edge_index: shape (2, E), row 0 = src, row 1 = dst.
    edge_index = jax.random.randint(ke, (2, E), 0, N, dtype=jnp.int32)

    # Compact int8 adjacency mask adj[dst, src] = 1, plus self-loops
    # (PyG GATConv default adds self-loops).
    adj = jnp.zeros((N, N), jnp.int8).at[edge_index[1], edge_index[0]].set(1)
    adj = adj.at[jnp.arange(N), jnp.arange(N)].set(1)

    conv_params, norm_params = init_params(kp, IN_CH, HID, NUM_LAYERS)

    out = gat_forward(x, adj, conv_params, norm_params, NUM_LAYERS)
    out = jax.block_until_ready(out)
    assert out.shape == (N, HID)
    assert bool(jnp.all(jnp.isfinite(out)))

    ref = jax.block_until_ready(
        gat_reference(x, adj, conv_params, norm_params, NUM_LAYERS,
                      _bf16_softmax_ok()))
    max_err = float(jnp.max(jnp.abs(out - ref)))
    assert max_err < 1e-2, f"mismatch vs reference: {max_err}"

    print("KERNEL_OK")
</pallas_src>

<mosaic_0001>
module attributes {stable_mosaic.version = 11 : i64} {
  func.func @kernel(%arg0: memref<16x32xbf16, #tpu.memory_space<vmem>>, %arg1: memref<16x16xf32, #tpu.memory_space<vmem>>, %arg2: memref<2x32x33xbf16, #tpu.memory_space<vmem>>, %arg3: memref<2x1x32xbf16, #tpu.memory_space<vmem>>, %arg4: memref<2x2x32xf32, #tpu.memory_space<vmem>>, %arg5: memref<16x32xf32, #tpu.memory_space<vmem>>) attributes {dimension_semantics = [], scalar_prefetch = 0 : i64, scratch_operands = 0 : i64, tpu.core_type = #tpu.core_type<tc>} {
    %c0 = arith.constant 0 : index
    %c0_0 = arith.constant 0 : index
    %0 = vector.load %arg1[%c0, %c0_0] : memref<16x16xf32, #tpu.memory_space<vmem>>, vector<16x16xf32>
    %c0_1 = arith.constant 0 : index
    %c0_2 = arith.constant 0 : index
    %1 = vector.load %arg0[%c0_1, %c0_2] : memref<16x32xbf16, #tpu.memory_space<vmem>>, vector<16x32xbf16>
    %c0_3 = arith.constant 0 : index
    %c0_4 = arith.constant 0 : index
    %c0_5 = arith.constant 0 : index
    %2 = vector.load %arg2[%c0_3, %c0_4, %c0_5] : memref<2x32x33xbf16, #tpu.memory_space<vmem>>, vector<1x32x33xbf16>
    %3 = vector.shape_cast %2 : vector<1x32x33xbf16> to vector<32x33xbf16>
    %c0_6 = arith.constant 0 : index
    %c0_7 = arith.constant 0 : index
    %c0_8 = arith.constant 0 : index
    %4 = vector.load %arg3[%c0_6, %c0_7, %c0_8] : memref<2x1x32xbf16, #tpu.memory_space<vmem>>, vector<1x1x32xbf16>
    %5 = vector.shape_cast %4 : vector<1x1x32xbf16> to vector<1x32xbf16>
    %c0_9 = arith.constant 0 : index
    %c0_10 = arith.constant 0 : index
    %c0_11 = arith.constant 0 : index
    %6 = vector.load %arg4[%c0_9, %c0_10, %c0_11] : memref<2x2x32xf32, #tpu.memory_space<vmem>>, vector<1x2x32xf32>
    %7 = vector.shape_cast %6 : vector<1x2x32xf32> to vector<2x32xf32>
    %8 = vector.extract_strided_slice %7 {offsets = [0, 0], sizes = [1, 32], strides = [1, 1]} : vector<2x32xf32> to vector<1x32xf32>
    %9 = vector.extract_strided_slice %7 {offsets = [1, 0], sizes = [1, 32], strides = [1, 1]} : vector<2x32xf32> to vector<1x32xf32>
    %cst = arith.constant dense<0.000000e+00> : vector<16x33xf32>
    %10 = tpu.matmul %1, %3, %cst {dimension_numbers = #tpu.dot_dimension_numbers<[1], [0], [0], [1], [0, 0, 1, 1], [], []>} : vector<16x32xbf16>, vector<32x33xbf16>, vector<16x33xf32> -> vector<16x33xf32>
    %11 = vector.extract_strided_slice %10 {offsets = [0, 0], sizes = [16, 32], strides = [1, 1]} : vector<16x33xf32> to vector<16x32xf32>
    %12 = vector.extract_strided_slice %10 {offsets = [0, 32], sizes = [16, 1], strides = [1, 1]} : vector<16x33xf32> to vector<16x1xf32>
    %cst_12 = arith.constant dense<0.000000e+00> : vector<1x16xf32>
    %13 = tpu.matmul %5, %1, %cst_12 {dimension_numbers = #tpu.dot_dimension_numbers<[1], [1], [0], [0], [0, 0, 1, 0], [], []>} : vector<1x32xbf16>, vector<16x32xbf16>, vector<1x16xf32> -> vector<1x16xf32>
    %14 = vector.broadcast %12 : vector<16x1xf32> to vector<16x16xf32>
    %15 = vector.broadcast %13 : vector<1x16xf32> to vector<16x16xf32>
    %16 = arith.addf %14, %15 : vector<16x16xf32>
    %cst_13 = arith.constant 2.000000e-01 : f32
    %17 = vector.broadcast %cst_13 : f32 to vector<16x16xf32>
    %18 = arith.mulf %17, %16 : vector<16x16xf32>
    %19 = arith.maximumf %16, %18 : vector<16x16xf32>
    %20 = arith.addf %19, %0 : vector<16x16xf32>
    %cst_14 = arith.constant dense<0xFF800000> : vector<16xf32>
    %21 = vector.multi_reduction <maximumf>, %20, %cst_14 [1] : vector<16x16xf32> to vector<16xf32>
    %22 = vector.shape_cast %21 : vector<16xf32> to vector<16x1xf32>
    %23 = vector.broadcast %22 : vector<16x1xf32> to vector<16x16xf32>
    %24 = arith.subf %20, %23 : vector<16x16xf32>
    %25 = arith.truncf %24 : vector<16x16xf32> to vector<16x16xbf16>
    %26 = math.exp %25 : vector<16x16xbf16>
    %27 = arith.extf %26 : vector<16x16xbf16> to vector<16x16xf32>
    %cst_15 = arith.constant dense<0.000000e+00> : vector<16xf32>
    %28 = vector.multi_reduction <add>, %27, %cst_15 [1] : vector<16x16xf32> to vector<16xf32>
    %29 = vector.shape_cast %28 : vector<16xf32> to vector<16x1xf32>
    %cst_16 = arith.constant 9.99999968E-21 : f32
    %30 = vector.broadcast %cst_16 : f32 to vector<16x1xf32>
    %31 = arith.maximumf %29, %30 : vector<16x1xf32>
    %32 = tpu.reciprocal %31 {approx = true} : vector<16x1xf32> -> vector<16x1xf32>
    %33 = arith.truncf %32 : vector<16x1xf32> to vector<16x1xbf16>
    %34 = vector.broadcast %33 : vector<16x1xbf16> to vector<16x16xbf16>
    %35 = arith.mulf %26, %34 : vector<16x16xbf16>
    %36 = arith.truncf %11 : vector<16x32xf32> to vector<16x32xbf16>
    %cst_17 = arith.constant dense<0.000000e+00> : vector<16x32xf32>
    %37 = tpu.matmul %35, %36, %cst_17 {dimension_numbers = #tpu.dot_dimension_numbers<[1], [0], [0], [1], [0, 0, 1, 1], [], []>} : vector<16x16xbf16>, vector<16x32xbf16>, vector<16x32xf32> -> vector<16x32xf32>
    %38 = vector.broadcast %8 : vector<1x32xf32> to vector<16x32xf32>
    %39 = arith.mulf %37, %38 : vector<16x32xf32>
    %40 = vector.broadcast %9 : vector<1x32xf32> to vector<16x32xf32>
    %41 = arith.addf %39, %40 : vector<16x32xf32>
    %cst_18 = arith.constant 0.000000e+00 : f32
    %42 = vector.broadcast %cst_18 : f32 to vector<16x32xf32>
    %43 = arith.maximumf %41, %42 : vector<16x32xf32>
    %44 = arith.truncf %43 : vector<16x32xf32> to vector<16x32xbf16>
    %c1 = arith.constant 1 : index
    %c0_19 = arith.constant 0 : index
    %c0_20 = arith.constant 0 : index
    %45 = vector.load %arg2[%c1, %c0_19, %c0_20] : memref<2x32x33xbf16, #tpu.memory_space<vmem>>, vector<1x32x33xbf16>
    %46 = vector.shape_cast %45 : vector<1x32x33xbf16> to vector<32x33xbf16>
    %c1_21 = arith.constant 1 : index
    %c0_22 = arith.constant 0 : index
    %c0_23 = arith.constant 0 : index
    %47 = vector.load %arg3[%c1_21, %c0_22, %c0_23] : memref<2x1x32xbf16, #tpu.memory_space<vmem>>, vector<1x1x32xbf16>
    %48 = vector.shape_cast %47 : vector<1x1x32xbf16> to vector<1x32xbf16>
    %c1_24 = arith.constant 1 : index
    %c0_25 = arith.constant 0 : index
    %c0_26 = arith.constant 0 : index
    %49 = vector.load %arg4[%c1_24, %c0_25, %c0_26] : memref<2x2x32xf32, #tpu.memory_space<vmem>>, vector<1x2x32xf32>
    %50 = vector.shape_cast %49 : vector<1x2x32xf32> to vector<2x32xf32>
    %51 = vector.extract_strided_slice %50 {offsets = [0, 0], sizes = [1, 32], strides = [1, 1]} : vector<2x32xf32> to vector<1x32xf32>
    %52 = vector.extract_strided_slice %50 {offsets = [1, 0], sizes = [1, 32], strides = [1, 1]} : vector<2x32xf32> to vector<1x32xf32>
    %cst_27 = arith.constant dense<0.000000e+00> : vector<16x33xf32>
    %53 = tpu.matmul %44, %46, %cst_27 {dimension_numbers = #tpu.dot_dimension_numbers<[1], [0], [0], [1], [0, 0, 1, 1], [], []>} : vector<16x32xbf16>, vector<32x33xbf16>, vector<16x33xf32> -> vector<16x33xf32>
    %54 = vector.extract_strided_slice %53 {offsets = [0, 0], sizes = [16, 32], strides = [1, 1]} : vector<16x33xf32> to vector<16x32xf32>
    %55 = vector.extract_strided_slice %53 {offsets = [0, 32], sizes = [16, 1], strides = [1, 1]} : vector<16x33xf32> to vector<16x1xf32>
    %cst_28 = arith.constant dense<0.000000e+00> : vector<1x16xf32>
    %56 = tpu.matmul %48, %44, %cst_28 {dimension_numbers = #tpu.dot_dimension_numbers<[1], [1], [0], [0], [0, 0, 1, 0], [], []>} : vector<1x32xbf16>, vector<16x32xbf16>, vector<1x16xf32> -> vector<1x16xf32>
    %57 = vector.broadcast %55 : vector<16x1xf32> to vector<16x16xf32>
    %58 = vector.broadcast %56 : vector<1x16xf32> to vector<16x16xf32>
    %59 = arith.addf %57, %58 : vector<16x16xf32>
    %cst_29 = arith.constant 2.000000e-01 : f32
    %60 = vector.broadcast %cst_29 : f32 to vector<16x16xf32>
    %61 = arith.mulf %60, %59 : vector<16x16xf32>
    %62 = arith.maximumf %59, %61 : vector<16x16xf32>
    %63 = arith.addf %62, %0 : vector<16x16xf32>
    %cst_30 = arith.constant dense<0xFF800000> : vector<16xf32>
    %64 = vector.multi_reduction <maximumf>, %63, %cst_30 [1] : vector<16x16xf32> to vector<16xf32>
    %65 = vector.shape_cast %64 : vector<16xf32> to vector<16x1xf32>
    %66 = vector.broadcast %65 : vector<16x1xf32> to vector<16x16xf32>
    %67 = arith.subf %63, %66 : vector<16x16xf32>
    %68 = arith.truncf %67 : vector<16x16xf32> to vector<16x16xbf16>
    %69 = math.exp %68 : vector<16x16xbf16>
    %70 = arith.extf %69 : vector<16x16xbf16> to vector<16x16xf32>
    %cst_31 = arith.constant dense<0.000000e+00> : vector<16xf32>
    %71 = vector.multi_reduction <add>, %70, %cst_31 [1] : vector<16x16xf32> to vector<16xf32>
    %72 = vector.shape_cast %71 : vector<16xf32> to vector<16x1xf32>
    %cst_32 = arith.constant 9.99999968E-21 : f32
    %73 = vector.broadcast %cst_32 : f32 to vector<16x1xf32>
    %74 = arith.maximumf %72, %73 : vector<16x1xf32>
    %75 = tpu.reciprocal %74 {approx = true} : vector<16x1xf32> -> vector<16x1xf32>
    %76 = arith.truncf %75 : vector<16x1xf32> to vector<16x1xbf16>
    %77 = vector.broadcast %76 : vector<16x1xbf16> to vector<16x16xbf16>
    %78 = arith.mulf %69, %77 : vector<16x16xbf16>
    %79 = arith.truncf %54 : vector<16x32xf32> to vector<16x32xbf16>
    %cst_33 = arith.constant dense<0.000000e+00> : vector<16x32xf32>
    %80 = tpu.matmul %78, %79, %cst_33 {dimension_numbers = #tpu.dot_dimension_numbers<[1], [0], [0], [1], [0, 0, 1, 1], [], []>} : vector<16x16xbf16>, vector<16x32xbf16>, vector<16x32xf32> -> vector<16x32xf32>
    %81 = vector.broadcast %51 : vector<1x32xf32> to vector<16x32xf32>
    %82 = arith.mulf %80, %81 : vector<16x32xf32>
    %83 = vector.broadcast %52 : vector<1x32xf32> to vector<16x32xf32>
    %84 = arith.addf %82, %83 : vector<16x32xf32>
    %c0_34 = arith.constant 0 : index
    %c0_35 = arith.constant 0 : index
    %85 = vector.load %arg5[%c0_34, %c0_35] : memref<16x32xf32, #tpu.memory_space<vmem>>, vector<16x32xf32>
    tpu.vector_store %arg5[%c0_34, %c0_35], %84 {strides = array<i32>} : memref<16x32xf32, #tpu.memory_space<vmem>>, vector<16x32xf32>,
    return
  }
}

</mosaic_0001>

<bundles_post_ra>
// kernel: tpu_custom_call.1
= control target key start
LH: loop header
LB: loop body
LE: loop exit
PB: predicated region body
PF: predicated region fallthrough
CT: control target
= control target key end

     0   :  { %10 = vsyncpa [#allocation3], 0  ;;  %s834_s0 = inlined_call_operand.hbm [shape: bf16[16,32], index: 0, kind: input, shape index: {}]   ;;  %s835_s1 = inlined_call_operand.hbm [shape: f32[16,16], index: 1, kind: input, shape index: {}]   ;;  %s836_s2 = inlined_call_operand.hbm [shape: bf16[2,32,33], index: 2, kind: input, shape index: {}]   ;;  %s837_s3 = inlined_call_operand.vmem [shape: bf16[2,1,32], index: 3, kind: input, shape index: {}]   ;;  %s838_s4 = inlined_call_operand.vmem [shape: f32[2,2,32], index: 4, kind: input, shape index: {}]   ;;  %s839_s5 = inlined_call_operand.hbm [shape: f32[16,32], index: 5, kind: output, shape index: {}]  }
   0x1   :  { %11 = vsyncpa [#allocation6], 0 }
   0x2   :  { %12 = vsyncpa [#allocation4], 0  ;;  %s703_s18 = smov [#allocation5]  }
   0x3   :  { %s30_s19 = sshll.u32 %s703_s18, 4  ;;  %s31_s19 = int_to_ptr.vmem [resolvable:$true] %s30_s19 }
   0x4   :  { %s625_s20 = scalar_lea.vmem %s31_s19, 256  ;;  %p630_p1 = scmp.lt.s32.totalorder %s31_s19, %s31_s19 }
   0x5   :  { %p626_p0 = scmp.ne.s32.totalorder %s31_s19, %s625_s20  ;;  %p631_p2 = scmp.lt.s32.totalorder %s625_s20, %s625_s20 }
   0x7   :  { %p632_p3 = por %p631_p2, %p630_p1 }
   0x9   :  { %p633_p4 = pnand %p632_p3, %p626_p0 }
   0xb   :  { %636 = shalt.err (!%p633_p4)
}
   0xc   :  { %s704_s21 = smov 128   ;;  %s705_s22 = smov 8  }
   0xd   :  { %36 = dma.hbm_to_vmem [thread:$0]  %s835_s1, 256, %s31_s19, [#allocation6], %s704_s21, %s704_s21, %s705_s22  }
   0xe   :  { %s706_s25 = smov [#allocation2]  }
   0xf   :  { %s18_s26 = sshll.u32 %s706_s25, 4  ;;  %s19_s26 = int_to_ptr.vmem [resolvable:$true] %s18_s26 }
  0x10   :  { %s645_s27 = scalar_lea.vmem %s19_s26, 128  ;;  %p650_p6 = scmp.lt.s32.totalorder %s19_s26, %s19_s26 }
  0x11   :  { %p646_p5 = scmp.ne.s32.totalorder %s19_s26, %s645_s27  ;;  %p651_p7 = scmp.lt.s32.totalorder %s645_s27, %s645_s27 }
  0x13   :  { %p652_p8 = por %p651_p7, %p650_p6 }
  0x15   :  { %p653_p9 = pnand %p652_p8, %p646_p5 }
  0x17   :  { %656 = shalt.err (!%p653_p9)
}
  0x18   :  { %s707_s28 = smov 64   ;;  %s708_s29 = smov 4  }
  0x19   :  { %24 = dma.hbm_to_vmem [thread:$0]  %s834_s0, 128, %s19_s26, [#allocation3], %s707_s28, %s707_s28, %s708_s29  }
  0x1a   :  { %s709_s7 = smov [#allocation7]  }
  0x1b   :  { %s42_s8 = sshll.u32 %s709_s7, 4  ;;  %s43_s8 = int_to_ptr.vmem [resolvable:$true] %s42_s8 }
  0x1c   :  { %s665_s1 = scalar_lea.vmem %s43_s8, 512  ;;  %p670_p11 = scmp.lt.s32.totalorder %s43_s8, %s43_s8 }
  0x1d   :  { %p666_p10 = scmp.ne.s32.totalorder %s43_s8, %s665_s1  ;;  %p671_p12 = scmp.lt.s32.totalorder %s665_s1, %s665_s1 }
  0x1f   :  { %p672_p13 = por %p671_p12, %p670_p11 }
  0x21   :  { %p673_p0 = pnand %p672_p13, %p666_p10 }
  0x23   :  { %676 = shalt.err (!%p673_p0)
}
  0x24   :  { %48 = dma.hbm_to_vmem [thread:$0]  %s836_s2, 512, %s43_s8, [#allocation6], %s707_s28, %s707_s28, %s708_s29  }
  0x25   :  { %697 = dma.done.wait [#allocation3], 128  }
  0x26   :  { %698 = vsyncadd [#allocation3], 4294967168 }
  0x27   :  { %699 = dma.done.wait [#allocation6], 768  }
  0x28   :  { %700 = vsyncadd [#allocation6], 4294966528  ;;  %v710_v0 = vmov 0.0   ;;  %vm711_vm0 = vmmov 0   ;;  %v712_v1 = vmov 32   ;;  %v600_v2 = vld [vmem:[#allocation7 + $0x8] sm:$0xff]   ;;  %v188_v16 = vlaneseq }
  0x29   :  { %547 = vmatprep.subr.bf16.mxu0 %v710_v0  ;;  %551 = vmatprep.mubr.msk.bf16.mxu0 %vm711_vm0, %v710_v0  ;;  %v601_v3 = vld [vmem:[#allocation7] sm:$0xff]   ;;  %v602_v4 = vld [vmem:[#allocation2] sm:$0xff]   ;;  %vm90_vm1 = vcmask 261120   ;;  %v782_v24 = vld [vmem:[#allocation5] sm:$0xff]  ;;  %vm200_vm2 = vcmask 130048   ;;  %s713_s16 = smov [#allocation8]  }
  0x2a   :  { %555 = vmatprep.subr.bf16.mxu1 %v710_v0  ;;  %557 = vmatprep.mubr.msk.bf16.mxu1 %vm711_vm0, %v710_v0  ;;  %v92_v5 = vsel %vm90_vm1, %v602_v4, 0  ;;  %v71_v6 = vld [vmem:[%s837_s3] sm:$0x1]  ;;  %v776_v17 = vshrl.u32 %v188_v16, 7  ;;  %v785_v29 = vld [vmem:[#allocation5 + $0x8] sm:$0xff]  ;;  %v604_v54 = vld [vmem:[#allocation7 + $0x10] sm:$0xff]  }
  0x2b   :  { %598 = vset.pattern.permute.xlu0 %v712_v1  ;;  %599 = vset.pattern.permute.xlu1 %v712_v1  ;;  %v603_v53 = vld [vmem:[#allocation7 + $0x18] sm:$0xff]   ;;  %v72_v55 = vld [vmem:[%s838_s4] sm:$0x3]  ;;  %s507_s17 = sshll.u32 %s713_s16, 4  ;;  %s508_s17 = int_to_ptr.vmem [resolvable:$true] %s507_s17 }
  0x2c   :  { %548 = vmatpush3.bf16.msra.mxu0 %v600_v2  ;;  %556 = vmatpush3.bf16.xpose.msra.mxu1 %v92_v5  ;;  %v779_v18 = vsub.s32 0, %v776_v17  ;;  %v280_v57 = vsub.s32 1, %v776_v17  ;;  %p682_p2 = scmp.lt.s32.totalorder %s508_s17, %s508_s17 }
  0x2d   :  { %549 = vmatprep.subr.bf16.mxu0 %v710_v0  ;;  %567 = vmatprep.subr.bf16.mxu1 %v710_v0 }
  0x2e   :  { %v275_v56 = vrot.slane %v72_v55, %v779_v18  ;;  %v281_v60 = vrot.slane %v72_v55, %v280_v57 }
  0x30   :  { %550 = vmatpush3.bf16.msra.mxu0 %v601_v3 }
  0x31   :  { %561 = vmatprep.subr.bf16.mxu0 %v710_v0 }
  0x33   :  { %552 = vmatmul.mubr.msk.bf16.vlgmr.msra.gmra.mxu0 %vm90_vm1, %v602_v4  ;;  %558 = vmatmul.mubr.msk.bf16.vlgmr.msra.gmra.mxu1 %vm90_vm1, %v71_v6 }
  0x34   :  { %563 = vmatprep.mubr.msk.bf16.mxu0 %vm711_vm0, %v710_v0  ;;  %571 = vmatprep.mubr.msk.bf16.mxu1 %vm711_vm0, %v710_v0 }
  0x35   :  { %568 = vmatpush3.bf16.msra.mxu1 %v603_v53 }
  0x36   :  { %569 = vmatprep.subr.bf16.mxu1 %v710_v0 }
  0x39   :  { %570 = vmatpush3.bf16.msra.mxu1 %v604_v54 }
  0x3a   :  { %581 = vmatprep.subr.bf16.mxu1 %v710_v0 }
  0xf3   :  { %v128_v7 = vpop.f32.mrf.mxu0  ;;  %v172_v9 = vpop.f32.mrf.mxu1 }
  0xf4   :  { %180 = vperm.xlu0 %598, %v128_v7   ;;  %v191_v19 = vrot.slane %v172_v9, %v779_v18 }
  0xf5   :  { %v553_v8 = vpop.f32.mrf.mxu0  ;;  %v559_v12 = vpop.f32.mrf.mxu1 }
  0xf6   :  { %v526_v8 = vld [vmem:[%s837_s3 + $0x1] sm:$0x1] }
  0xf7   :  { %v131_v10 = vpop.f32.mrf.mxu0  ;;  %v175_v14 = vpop.f32.mrf.mxu1 }
  0xf8   :  { %v227_v11 = vpack.c.bf16 %v131_v10, %v128_v7  ;;  %185 = vperm.xlu0 %598, %v131_v10  }
  0xf9   :  { %v554_v13 = vpop.f32.mrf.mxu0  ;;  %v560_v15 = vpop.f32.mrf.mxu1 }
  0xfa   :  { %562 = vmatpush3.bf16.msra.mxu0 %v227_v11 }
  0xfb   :  { %575 = vmatprep.subr.bf16.mxu0 %v710_v0 }
 0x16f   :  { %v181_v20 = vpop.permute.xlu0 %180 }
 0x170   :  { %v192_v21 = vadd.f32 %v191_v19, %v181_v20 }
 0x172   :  { %v194_v22 = vmul.f32 0.2, %v192_v21 }
 0x173   :  { %v186_v23 = vpop.permute.xlu0 %185 }
 0x174   :  { %v196_v25 = vmax.f32 %v192_v21, %v194_v22  ;;  %v193_v26 = vadd.f32 %v191_v19, %v186_v23 }
 0x176   :  { %v195_v27 = vmul.f32 0.2, %v193_v26  ;;  %v198_v28 = vadd.f32 %v196_v25, %v782_v24 }
 0x178   :  { %v197_v30 = vmax.f32 %v193_v26, %v195_v27  ;;  %v201_v31 = vsel %vm200_vm2, %v198_v28, -inf }
 0x179   :  { %202 = vmax.xlane.f32.xlu1 %v201_v31 }
 0x17a   :  { %v199_v32 = vadd.f32 %v197_v30, %v785_v29 }
 0x17c   :  { %v204_v33 = vsel %vm200_vm2, %v199_v32, -inf }
 0x17d   :  { %205 = vmax.xlane.f32.xlu1 %v204_v33 }
 0x202   :  { %v203_v34 = vpop.xlane.xlu1 %202 }
 0x203   :  { %v207_v36 = vsub.f32 %v198_v28, %v203_v34 }
 0x206   :  { %v206_v35 = vpop.xlane.xlu1 %205 }
 0x207   :  { %v208_v37 = vsub.f32 %v199_v32, %v206_v35 }
 0x209   :  { %v209_v38 = vpack.c.bf16 %v208_v37, %v207_v36 }
 0x20b   :  { %v211_v39 = vmul.bf16 1069105081, %v209_v38 }
 0x20d   :  { %605 = vpow.bf16 %v211_v39 }
 0x21b   :  { %v606_v40 = vpop.eup %605 }
 0x21c   :  { %v214_v41 = vunpack.c.h.bf16 %v606_v40  ;;  %v213_v42 = vunpack.c.l.bf16 %v606_v40 }
 0x21e   :  { %v218_v43 = vsel %vm200_vm2, %v214_v41, 0.0  ;;  %v215_v44 = vsel %vm200_vm2, %v213_v42, 0.0 }
 0x21f   :  { %219 = vadd.xlane.f32.xlu1 %v218_v43  ;;  %216 = vadd.xlane.f32.xlu0 %v215_v44 }
 0x2a8   :  { %v220_v45 = vpop.xlane.xlu1 %219  ;;  %v217_v46 = vpop.xlane.xlu0 %216 }
 0x2a9   :  { %v222_v47 = vmax.f32 %v220_v45, 1e-20  ;;  %v221_v48 = vmax.f32 %v217_v46, 1e-20 }
 0x2ab   :  { %607 = vrcp.f32 %v222_v47 }
 0x2ac   :  { %609 = vrcp.f32 %v221_v48 }
 0x2b8   :  { %v608_v49 = vpop.eup %607 }
 0x2b9   :  { %v610_v50 = vpop.eup %609 }
 0x2ba   :  { %v225_v51 = vpack.c.bf16 %v608_v49, %v610_v50 }
 0x2bc   :  { %v226_v52 = vmul.bf16 %v606_v40, %v225_v51  ;;  %v527_v51 = vld [vmem:[%s838_s4 + $0x2] sm:$0x3]  ;;  %s677_s4 = scalar_lea.vmem %s508_s17, 256 }
 0x2bd   :  { %v497_v53 = vrot.slane %v527_v51, %v280_v57  ;;  %p678_p1 = scmp.ne.s32.totalorder %s508_s17, %s677_s4  ;;  %p683_p3 = scmp.lt.s32.totalorder %s677_s4, %s677_s4 }
 0x2be   :  { %564 = vmatmul.mubr.msk.bf16.vlgmr.msra.gmra.mxu0 %vm200_vm2, %v226_v52  ;;  %v491_v52 = vrot.slane %v527_v51, %v779_v18 }
 0x2bf   :  { %577 = vmatprep.mubr.msk.bf16.mxu0 %vm711_vm0, %v710_v0  ;;  %p684_p4 = por %p683_p3, %p682_p2 }
 0x2c1   :  { %p685_p5 = pnand %p684_p4, %p678_p1 }
 0x37e   :  { %v265_v58 = vpop.f32.mrf.mxu0 }
 0x37f   :  { %v276_v59 = vmul.f32 %v275_v56, %v265_v58 }
 0x380   :  { %v565_v61 = vpop.f32.mrf.mxu0 }
 0x381   :  { %v282_v63 = vadd.f32 %v281_v60, %v276_v59 }
 0x382   :  { %v268_v62 = vpop.f32.mrf.mxu0 }
 0x383   :  { %v277_v1 = vmul.f32 %v275_v56, %v268_v62  ;;  %v284_v4 = vmax.f32 %v282_v63, 0.0 }
 0x384   :  { %v566_v2 = vpop.f32.mrf.mxu0 }
 0x385   :  { %v283_v3 = vadd.f32 %v281_v60, %v277_v1 }
 0x387   :  { %v285_v5 = vmax.f32 %v283_v3, 0.0 }
 0x389   :  { %v286_v6 = vpack.c.bf16 %v285_v5, %v284_v4 }
 0x38b   :  { %572 = vmatmul.mubr.msk.bf16.vlgmr.msra.gmra.mxu1 %vm90_vm1, %v286_v6  ;;  %v309_v7 = vsel %vm90_vm1, %v286_v6, 0 }
 0x38c   :  { %576 = vmatpush3.bf16.xpose.msra.mxu0 %v309_v7  ;;  %583 = vmatprep.mubr.msk.bf16.mxu1 %vm711_vm0, %v710_v0 }
 0x393   :  { %578 = vmatmul.mubr.msk.bf16.vlgmr.msra.gmra.mxu0 %vm90_vm1, %v526_v8 }
 0x44b   :  { %v345_v9 = vpop.f32.mrf.mxu1 }
 0x44c   :  { %397 = vperm.xlu1 %599, %v345_v9  }
 0x44d   :  { %v573_v10 = vpop.f32.mrf.mxu1 }
 0x44f   :  { %v348_v11 = vpop.f32.mrf.mxu1 }
 0x450   :  { %v443_v12 = vpack.c.bf16 %v348_v11, %v345_v9  ;;  %402 = vperm.xlu1 %599, %v348_v11  }
 0x451   :  { %v574_v13 = vpop.f32.mrf.mxu1 }
 0x452   :  { %582 = vmatpush3.bf16.msra.mxu1 %v443_v12 }
 0x453   :  { %v389_v14 = vpop.f32.mrf.mxu0 }
 0x454   :  { %v408_v0 = vrot.slane %v389_v14, %v779_v18 }
 0x455   :  { %v579_v15 = vpop.f32.mrf.mxu0 }
 0x457   :  { %v392_v16 = vpop.f32.mrf.mxu0 }
 0x459   :  { %v580_v19 = vpop.f32.mrf.mxu0 }
 0x4c7   :  { %v398_v20 = vpop.permute.xlu1 %397 }
 0x4c8   :  { %v409_v21 = vadd.f32 %v408_v0, %v398_v20 }
 0x4ca   :  { %v411_v22 = vmul.f32 0.2, %v409_v21 }
 0x4cb   :  { %v403_v23 = vpop.permute.xlu1 %402 }
 0x4cc   :  { %v413_v25 = vmax.f32 %v409_v21, %v411_v22  ;;  %v410_v26 = vadd.f32 %v408_v0, %v403_v23 }
 0x4ce   :  { %v412_v27 = vmul.f32 0.2, %v410_v26  ;;  %v415_v28 = vadd.f32 %v413_v25, %v782_v24 }
 0x4d0   :  { %v414_v30 = vmax.f32 %v410_v26, %v412_v27  ;;  %v417_v31 = vsel %vm200_vm2, %v415_v28, -inf }
 0x4d1   :  { %418 = vmax.xlane.f32.xlu1 %v417_v31 }
 0x4d2   :  { %v416_v32 = vadd.f32 %v414_v30, %v785_v29 }
 0x4d4   :  { %v420_v33 = vsel %vm200_vm2, %v416_v32, -inf }
 0x4d5   :  { %421 = vmax.xlane.f32.xlu0 %v420_v33 }
 0x55a   :  { %v419_v34 = vpop.xlane.xlu1 %418 }
 0x55b   :  { %v423_v36 = vsub.f32 %v415_v28, %v419_v34 }
 0x55e   :  { %v422_v35 = vpop.xlane.xlu0 %421 }
 0x55f   :  { %v424_v37 = vsub.f32 %v416_v32, %v422_v35 }
 0x561   :  { %v425_v38 = vpack.c.bf16 %v424_v37, %v423_v36 }
 0x563   :  { %v427_v39 = vmul.bf16 1069105081, %v425_v38 }
 0x565   :  { %611 = vpow.bf16 %v427_v39 }
 0x573   :  { %v612_v40 = vpop.eup %611 }
 0x574   :  { %v429_v41 = vunpack.c.l.bf16 %v612_v40  ;;  %v430_v42 = vunpack.c.h.bf16 %v612_v40 }
 0x576   :  { %v431_v24 = vsel %vm200_vm2, %v429_v41, 0.0  ;;  %v434_v43 = vsel %vm200_vm2, %v430_v42, 0.0 }
 0x577   :  { %432 = vadd.xlane.f32.xlu0 %v431_v24 }
 0x57b   :  { %435 = vadd.xlane.f32.xlu0 %v434_v43 }
 0x600   :  { %v433_v29 = vpop.xlane.xlu0 %432 }
 0x601   :  { %v437_v44 = vmax.f32 %v433_v29, 1e-20 }
 0x603   :  { %613 = vrcp.f32 %v437_v44 }
 0x604   :  { %v436_v45 = vpop.xlane.xlu0 %435 }
 0x605   :  { %v438_v46 = vmax.f32 %v436_v45, 1e-20 }
 0x607   :  { %615 = vrcp.f32 %v438_v46 }
 0x610   :  { %v614_v47 = vpop.eup %613 }
 0x614   :  { %v616_v48 = vpop.eup %615 }
 0x615   :  { %v441_v49 = vpack.c.bf16 %v616_v48, %v614_v47 }
 0x617   :  { %v442_v50 = vmul.bf16 %v612_v40, %v441_v49 }
 0x619   :  { %584 = vmatmul.mubr.msk.bf16.vlgmr.msra.gmra.mxu1 %vm200_vm2, %v442_v50 }
 0x6d9   :  { %v481_v54 = vpop.f32.mrf.mxu1 }
 0x6da   :  { %v492_v55 = vmul.f32 %v491_v52, %v481_v54 }
 0x6db   :  { %v585_v56 = vpop.f32.mrf.mxu1 }
 0x6dc   :  { %v498_v58 = vadd.f32 %v497_v53, %v492_v55 }
 0x6dd   :  { %v484_v59 = vpop.f32.mrf.mxu1 }
 0x6de   :  { %500 = vst.msk [vmem:[#allocation8] sm:$0xff] %vm90_vm1, %v498_v58  ;;  %v493_v60 = vmul.f32 %v491_v52, %v484_v59 }
 0x6df   :  { %v586_v61 = vpop.f32.mrf.mxu1 }
 0x6e0   :  { %v499_v62 = vadd.f32 %v497_v53, %v493_v60 }
 0x6e2   :  { %501 = vst.msk [vmem:[#allocation8 + $0x8] sm:$0xff] %vm90_vm1, %v499_v62 }
 0x6e3   :  { %688 = shalt.err (!%p685_p5)
}
 0x6e4   :  { %513 = dma.vmem_to_hbm [thread:$0]  %s508_s17, 256, %s839_s5, [#allocation4], %s704_s21, %s704_s21, %s705_s22  }
 0x6e5   :  { %701 = dma.done.wait [#allocation4], 256  }
 0x6e6   :  { %702 = vsyncadd [#allocation4], 4294967040 }
 0x6e7   :  { %517 = vsyncpa [#allocation3], 1 }
 0x6e8   :  { %518 = vsyncpa [#allocation6], 1 }
 0x6e9   :  { %519 = vsyncpa [#allocation4], 1 }

</bundles_post_ra>
